<compile_context>
chip_gen: v7x
topology: tpu7x:2x2x1
jax: 0.10.0
libtpu: 0.0.40
codegen_flags: <defaults>
</compile_context>

<pallas_src>
import jax
import jax.numpy as jnp
from jax.experimental import pallas as pl
from jax.experimental.pallas import tpu as pltpu


def _round_up(x: int, m: int) -> int:
    return (x + m - 1) // m * m


def _policy_head_kernel(x_ref, w_ref, b_ref, o_ref, acc_ref):
    # x_ref: [tm, tk] bf16   w_ref: [tk, Np] bf16   b_ref: [1, Np] f32
    # o_ref: [tm, Np] f32    acc_ref: [tm, Np] f32 (VMEM scratch, K-resident)
    k = pl.program_id(1)

    @pl.when(k == 0)
    def _():
        acc_ref[...] = jnp.zeros_like(acc_ref)

    acc_ref[...] += jnp.dot(
        x_ref[...], w_ref[...], preferred_element_type=jnp.float32
    )

    @pl.when(k == pl.num_programs(1) - 1)
    def _():
        # Bias add + cast only once, in f32 (v5e VPU has no bf16 path).
        o_ref[...] = (acc_ref[...] + b_ref[...]).astype(o_ref.dtype)


def policy_head(x_flat: jax.Array, w: jax.Array, b: jax.Array,
                *, tm: int = 128, tk: int = 512) -> jax.Array:
    """[B, D] @ [D, N] + [N] -> [B, N] via a K-tiled, M-parallel Pallas matmul."""
    B, D = x_flat.shape
    Dw, N = w.shape
    assert Dw == D

    # Lane-dense output / weight columns: pad N up to a multiple of 128.
    Np = _round_up(N, 128)
    # Sublane-dense batch for bf16: pad B up to a multiple of 16.
    Bp = _round_up(B, 16)
    tm = min(tm, Bp)
    Bp = _round_up(Bp, tm)          # tm must divide the padded batch
    # K tiles: multiple of 128 (lane dim of the x block).
    Dp = _round_up(D, 128)
    tk = min(tk, Dp)
    Dp = _round_up(Dp, tk)          # tk must divide the padded K extent

    # bf16 operands (f32 accumulation in-kernel), zero-padded to tiled shapes.
    x_pad = jnp.zeros((Bp, Dp), jnp.bfloat16).at[:B, :D].set(
        x_flat.astype(jnp.bfloat16))
    w_pad = jnp.zeros((Dp, Np), jnp.bfloat16).at[:D, :N].set(
        w.astype(jnp.bfloat16))
    b_pad = jnp.zeros((1, Np), jnp.float32).at[0, :N].set(
        b.astype(jnp.float32))

    grid = (Bp // tm, Dp // tk)

    out = pl.pallas_call(
        _policy_head_kernel,
        out_shape=jax.ShapeDtypeStruct((Bp, Np), jnp.float32),
        grid_spec=pltpu.PrefetchScalarGridSpec(
            num_scalar_prefetch=0,
            grid=grid,
            in_specs=[
                pl.BlockSpec((tm, tk), lambda i, k: (i, k)),   # x tile
                pl.BlockSpec((tk, Np), lambda i, k: (k, 0)),   # w tile (dominant stream)
                pl.BlockSpec((1, Np), lambda i, k: (0, 0)),    # bias (resident)
            ],
            out_specs=pl.BlockSpec((tm, Np), lambda i, k: (i, 0)),
            scratch_shapes=[pltpu.VMEM((tm, Np), jnp.float32)],
        ),
        compiler_params=pltpu.CompilerParams(
            dimension_semantics=("parallel", "arbitrary"),
        ),
        cost_estimate=pl.CostEstimate(
            flops=2 * Bp * Dp * Np,
            transcendentals=0,
            bytes_accessed=(Bp * Dp + Dp * Np) * 2 + (Bp * Np + Np) * 4,
        ),
    )(x_pad, w_pad, b_pad)

    return out[:B, :N]


class BaseMethodPallas:
    """
    JAX/Pallas analogue of `BaseMethod`.

    forward(observations: dict[str, jnp.ndarray], training=True)
        -> BatchedActionSequence of shape [B, seq_len, act_dim]
    """

    def __init__(self, obs_dim: int, seq_len: int = 8, act_dim: int = 4,
                 accelerator=None):
        self.accelerator = accelerator  # no-op in JAX; see TODO(synk) above
        self.seq_len = seq_len
        self.act_dim = act_dim
        N = seq_len * act_dim
        # Deterministic parameter initialization (synthetic, not a checkpoint).
        kw, kb = jax.random.split(jax.random.PRNGKey(42))
        self.w = (jax.random.normal(kw, (obs_dim, N), dtype=jnp.float32)
                  * (1.0 / jnp.sqrt(obs_dim)))
        self.b = jax.random.normal(kb, (N,), dtype=jnp.float32) * 0.01

    def forward(self, observations: dict, training: bool = True):
        x = observations["rgb"]                        # [B, C, H, W] (NCHW)
        B = x.shape[0]
        x_flat = x.reshape(B, -1).astype(jnp.float32)  # [B, D], D = C*H*W
        out = policy_head(x_flat, self.w, self.b)      # [B, seq_len*act_dim]
        return out.reshape(B, self.seq_len, self.act_dim)

    __call__ = forward


if __name__ == "__main__":
    key = jax.random.PRNGKey(0)
    B, C, H, W = 2, 4, 16, 16
    obs = {"rgb": jax.random.normal(key, (B, C, H, W), dtype=jnp.float32)}

    method = BaseMethodPallas(obs_dim=C * H * W, seq_len=8, act_dim=4)
    actions = method(obs, training=False)
    actions = jax.block_until_ready(actions)

    # Reference in the same numerics (bf16 operands, f32 accumulation + bias).
    x_flat = obs["rgb"].reshape(B, -1)
    ref = (jnp.dot(x_flat.astype(jnp.bfloat16), method.w.astype(jnp.bfloat16),
                   preferred_element_type=jnp.float32)
           + method.b).reshape(B, 8, 4)

    assert actions.shape == (B, 8, 4)
    assert jnp.allclose(actions, ref, atol=1e-3, rtol=1e-3)

    print("KERNEL_OK")
</pallas_src>

<mosaic_0001>
module attributes {stable_mosaic.version = 11 : i64} {
  func.func @_policy_head_kernel(%arg0: i32, %arg1: i32, %arg2: memref<16x512xbf16, #tpu.memory_space<vmem>>, %arg3: memref<512x128xbf16, #tpu.memory_space<vmem>>, %arg4: memref<1x128xf32, #tpu.memory_space<vmem>>, %arg5: memref<16x128xf32, #tpu.memory_space<vmem>>, %arg6: memref<16x128xf32, #tpu.memory_space<vmem>>) attributes {dimension_semantics = [#tpu.dimension_semantics<parallel>, #tpu.dimension_semantics<arbitrary>], iteration_bounds = array<i64: 1, 2>, scalar_prefetch = 0 : i64, scratch_operands = 1 : i64, tpu.core_type = #tpu.core_type<tc>, window_params = [{transform_indices = @transform_0, window_bounds = array<i64: 16, 512>}, {transform_indices = @transform_1, window_bounds = array<i64: 512, 128>}, {pipeline_mode = #tpu.pipeline_mode<synchronous>, transform_indices = @transform_2, window_bounds = array<i64: 1, 128>}, {transform_indices = @transform_3, window_bounds = array<i64: 16, 128>}]} {
    %c0_i32 = arith.constant 0 : i32
    %0 = arith.cmpi eq, %arg1, %c0_i32 : i32
    %1 = arith.extui %0 : i1 to i32
    %c0_i32_0 = arith.constant 0 : i32
    %2 = arith.cmpi ne, %1, %c0_i32_0 : i32
    scf.if %2 {
      %cst_9 = arith.constant 0.000000e+00 : f32
      %12 = vector.broadcast %cst_9 : f32 to vector<16x128xf32>
      %c0_10 = arith.constant 0 : index
      %c0_11 = arith.constant 0 : index
      %13 = vector.load %arg6[%c0_10, %c0_11] : memref<16x128xf32, #tpu.memory_space<vmem>>, vector<16x128xf32>
      tpu.vector_store %arg6[%c0_10, %c0_11], %12 {strides = array<i32>} : memref<16x128xf32, #tpu.memory_space<vmem>>, vector<16x128xf32>,
    } else {
    }
    %c0 = arith.constant 0 : index
    %c0_1 = arith.constant 0 : index
    %3 = vector.load %arg6[%c0, %c0_1] : memref<16x128xf32, #tpu.memory_space<vmem>>, vector<16x128xf32>
    %c0_2 = arith.constant 0 : index
    %c0_3 = arith.constant 0 : index
    %4 = vector.load %arg2[%c0_2, %c0_3] : memref<16x512xbf16, #tpu.memory_space<vmem>>, vector<16x512xbf16>
    %c0_4 = arith.constant 0 : index
    %c0_5 = arith.constant 0 : index
    %5 = vector.load %arg3[%c0_4, %c0_5] : memref<512x128xbf16, #tpu.memory_space<vmem>>, vector<512x128xbf16>
    %cst = arith.constant dense<0.000000e+00> : vector<16x128xf32>
    %6 = tpu.matmul %4, %5, %cst {dimension_numbers = #tpu.dot_dimension_numbers<[1], [0], [0], [1], [0, 0, 1, 1], [], []>} : vector<16x512xbf16>, vector<512x128xbf16>, vector<16x128xf32> -> vector<16x128xf32>
    %7 = arith.addf %3, %6 : vector<16x128xf32>
    %c0_6 = arith.constant 0 : index
    %c0_7 = arith.constant 0 : index
    %8 = vector.load %arg6[%c0_6, %c0_7] : memref<16x128xf32, #tpu.memory_space<vmem>>, vector<16x128xf32>
    tpu.vector_store %arg6[%c0_6, %c0_7], %7 {strides = array<i32>} : memref<16x128xf32, #tpu.memory_space<vmem>>, vector<16x128xf32>,
    %c1_i32 = arith.constant 1 : i32
    %9 = arith.cmpi eq, %arg1, %c1_i32 : i32
    %10 = arith.extui %9 : i1 to i32
    %c0_i32_8 = arith.constant 0 : i32
    %11 = arith.cmpi ne, %10, %c0_i32_8 : i32
    scf.if %11 {
      %c0_9 = arith.constant 0 : index
      %c0_10 = arith.constant 0 : index
      %12 = vector.load %arg6[%c0_9, %c0_10] : memref<16x128xf32, #tpu.memory_space<vmem>>, vector<16x128xf32>
      %c0_11 = arith.constant 0 : index
      %c0_12 = arith.constant 0 : index
      %13 = vector.load %arg4[%c0_11, %c0_12] : memref<1x128xf32, #tpu.memory_space<vmem>>, vector<1x128xf32>
      %14 = vector.broadcast %13 : vector<1x128xf32> to vector<16x128xf32>
      %15 = arith.addf %12, %14 : vector<16x128xf32>
      %c0_13 = arith.constant 0 : index
      %c0_14 = arith.constant 0 : index
      %16 = vector.load %arg5[%c0_13, %c0_14] : memref<16x128xf32, #tpu.memory_space<vmem>>, vector<16x128xf32>
      tpu.vector_store %arg5[%c0_13, %c0_14], %15 {strides = array<i32>} : memref<16x128xf32, #tpu.memory_space<vmem>>, vector<16x128xf32>,
    } else {
    }
    return
  }
  func.func @transform_0(%arg0: i32, %arg1: i32) -> (i32, i32) {
    %c0_i32 = arith.constant 0 : i32
    return %arg0, %arg1 : i32, i32
  }
  func.func @transform_1(%arg0: i32, %arg1: i32) -> (i32, i32) {
    %c0_i32 = arith.constant 0 : i32
    %c0_i32_0 = arith.constant 0 : i32
    return %arg1, %c0_i32 : i32, i32
  }
  func.func @transform_2(%arg0: i32, %arg1: i32) -> (i32, i32) {
    %c0_i32 = arith.constant 0 : i32
    %c0_i32_0 = arith.constant 0 : i32
    %c0_i32_1 = arith.constant 0 : i32
    return %c0_i32, %c0_i32_0 : i32, i32
  }
  func.func @transform_3(%arg0: i32, %arg1: i32) -> (i32, i32) {
    %c0_i32 = arith.constant 0 : i32
    %c0_i32_0 = arith.constant 0 : i32
    return %arg0, %c0_i32 : i32, i32
  }
}

</mosaic_0001>

<bundles_post_ra>
// kernel: tpu_custom_call.1
= control target key start
LH: loop header
LB: loop body
LE: loop exit
PB: predicated region body
PF: predicated region fallthrough
CT: control target
= control target key end

     0   :  { %8 = vsyncpa [#allocation4], 0  ;;  %s1369_s0 = inlined_call_operand.hbm [shape: bf16[16,1024], index: 0, kind: input, shape index: {}]   ;;  %s1370_s1 = inlined_call_operand.hbm [shape: bf16[1024,128], index: 1, kind: input, shape index: {}]   ;;  %s1371_s2 = inlined_call_operand.vmem [shape: f32[1,128], index: 2, kind: input, shape index: {}]   ;;  %s1372_s3 = inlined_call_operand.hbm [shape: f32[16,128], index: 3, kind: output, shape index: {}]  }
   0x1   :  { %10 = vsyncpa [#allocation4 + $0x1], 0 }
   0x2   :  { %11 = vsyncpa [#allocation7], 0 }
   0x3   :  { %13 = vsyncpa [#allocation7 + $0x1], 0 }
   0x4   :  { %14 = vsyncpa [#allocation5], 0  ;;  %s1125_s12 = smov 0   ;;  %s1127_s13 = smov 0  }
   0x5   :  { %s1129_s14 = smov 0   ;;  %s1131_s15 = smov 0  }
   0x6   :  { %s1133_s16 = smov 0   ;;  %s1135_s17 = smov 0  }
   0x7 LB: > { %s734_s18 = sadd.s32 4294967295, %s1092_s17   ;;  %s29_s19 = sadd.s32 1, %s1088_s16  ;;  %s1092_s17 = sphi %s1135_s17, %s20_s17   ;;  %s1088_s16 = sphi %s1133_s16, %s1385_s16   ;;  %s1084_s15 = sphi %s1131_s15, %s1384_s15   ;;  %s1080_s14 = sphi %s1129_s14, %s1383_s14   ;;  %s1076_s13 = sphi %s1127_s13, %s1382_s13   ;;  %s1072_s12 = sphi %s1125_s12, %s1381_s12  }
   0x8   : > { %p30_p0 = scmp.ge.s32.totalorder %s29_s19, 2  ;;  %s41_s20 = sadd.s32 1, %s1080_s14 }
   0x9   : > { %p48_p1 = scmp.ne.s32.totalorder %s1080_s14, %s1076_s13  ;;  %p49_p2 = scmp.eq.s32.totalorder %s1092_s17, 0 }
   0xa   : > { %s1387_s19 = smov (%p30_p0, %s29_s19), 0  ;;  %p54_p4 = scmp.ne.s32.totalorder %s1076_s13, %s1072_s12 }
   0xb   : > { %p1161_p3 = por %p49_p2, %p48_p1  ;;  %s37_s22 = ssub.s32 %s1088_s16, %s1387_s19 }
   0xc   : > { %p55_p5 = scmp.eq.s32.totalorder %s734_s18, 0  ;;  %p39_p6 = scmp.eq.s32.totalorder %s37_s22, 0 }
   0xd   : > { %p850_p8 = scmp.lt.s32.totalorder %s1092_s17, 2  ;;  %s1179_s25 = sand.u32 1, %s1080_s14  }
   0xe   : > { %p1170_p7 = por %p55_p5, %p54_p4  ;;  %s789_s26 = sshll.u32 %s1088_s16, 8 }
   0xf   : > { %s1176_s24 = scalar_select %p39_p6, %s1080_s14, %s41_s20  }
  0x10   : > { %s1375_s23 = scalar_select %p1170_p7, 1, 0 }
  0x11   : > { %s737_s27 = sshll.u32 %s1179_s25, 5  ;;  %s1186_s30 = scalar_lea.hbm %s1369_s0, %s789_s26 }
  0x12   : > { %s158_s4 = scalar_lea.vmem [#allocation3], %s737_s27  ;;  %p1190_p9 = pnand %p850_p8, %p1161_p3 }
  0x13   : > { %s168_s5 = sshll.u32 %s158_s4, 4  ;;  %s155_s7 = scalar_lea.sflag [#allocation4], %s1179_s25  ;;  %s1194_s5 = int_to_ptr.vmem [resolvable:$true] %s168_s5 }
  0x14   : > { %s948_s8 = scalar_lea.hbm %s1186_s30, 512  ;;  %p950_p12 = pneg %p1190_p9 }
  0x15   : > { %p949_p11 = scmp.ne.s32.totalorder %s1186_s30, %s948_s8  ;;  %s953_s11 = scalar_lea.hbm %s1369_s0, 1024 }
  0x16   : > { %p954_p1 = scmp.lt.u32.totalorder %s1186_s30, %s1369_s0  ;;  %p955_p2 = scmp.lt.u32.totalorder %s953_s11, %s948_s8 }
  0x17   : > { %p951_p13 = pnand %p950_p12, %p949_p11  ;;  %p957_p4 = scmp.lt.u32.totalorder %s948_s8, %s1186_s30 }
  0x18   : > { %p956_p3 = por %p955_p2, %p954_p1 }
  0x19   : > { %p952_p0 = pneg %p951_p13 }
  0x1a   : > { %p958_p5 = por %p957_p4, %p956_p3 }
  0x1c   : > { %p959_p6 = pnand %p958_p5, %p952_p0 }
  0x1e   : > { %962 = shalt.err (!%p959_p6)
}
  0x1f   : > { %s963_s21 = scalar_lea.vmem %s1194_s5, 512  ;;  %s1094_s22 = smov [#allocation3]  }
  0x20   : > { %p964_p8 = scmp.ne.s32.totalorder %s1194_s5, %s963_s21  ;;  %s968_s26 = sshll.u32 %s1094_s22, 4  ;;  %s969_s26 = int_to_ptr.vmem [resolvable:$false] %s968_s26 }
  0x21   : > { %s970_s27 = scalar_lea.vmem %s969_s26, 1024  ;;  %p971_p10 = scmp.lt.s32.totalorder %s1194_s5, %s969_s26 }
  0x22   : > { %p966_p11 = pnand %p964_p8, %p950_p12  ;;  %p972_p1 = scmp.lt.s32.totalorder %s970_s27, %s963_s21 }
  0x24   : > { %p967_p13 = pneg %p966_p11  ;;  %p973_p2 = por %p972_p1, %p971_p10 }
  0x26   : > { %p974_p3 = pnand %p973_p2, %p967_p13 }
  0x28   : > { %977 = shalt.err (!%p974_p3)
}
  0x29   : > { %s1095_s28 = smov 512   ;;  %s1096_s29 = smov 256  }
  0x2a   : > { %s1097_s4 = smov 16   ;;  %p197_p0 = scmp.lt.s32.totalorder %s1092_s17, 3 }
  0x2b   : > { %846 = dma.hbm_to_vmem [thread:$0]  (!%p1190_p9), %s1186_s30, 512, %s1194_s5, %s155_s7, %s1095_s28, %s1096_s29, %s1097_s4  }
  0x2c   : > { %s740_s8 = sshll.u32 %s1179_s25, 8  ;;  %s790_s9 = sshll.u32 %s1088_s16, 12 }
  0x2d   : > { %p1377_p10 = scmp.ge.s32.totalorder %s1092_s17, 1  ;;  %s1237_s20 = scalar_lea.hbm %s1370_s1, %s790_s9 }
  0x2e   : > { %s182_s21 = scalar_lea.vmem [#allocation6], %s740_s8  ;;  %s179_s30 = scalar_lea.sflag [#allocation7], %s1179_s25 }
  0x2f   : > { %p1230_p4 = pnand %p1377_p10, %p197_p0  ;;  %s189_s22 = sshll.u32 %s182_s21, 4  ;;  %s1239_s22 = int_to_ptr.vmem [resolvable:$true] %s189_s22 }
  0x30   : > { %s978_s5 = scalar_lea.hbm %s1237_s20, 4096  ;;  %s983_s27 = scalar_lea.hbm %s1370_s1, 8192 }
  0x31   : > { %p979_p5 = scmp.ne.s32.totalorder %s1237_s20, %s978_s5  ;;  %p984_p11 = scmp.lt.u32.totalorder %s1237_s20, %s1370_s1 }
  0x32   : > { %p985_p13 = scmp.lt.u32.totalorder %s983_s27, %s978_s5  ;;  %p987_p2 = scmp.lt.u32.totalorder %s978_s5, %s1237_s20 }
  0x33   : > { %p981_p6 = pnand %p979_p5, %p950_p12 }
  0x34   : > { %p986_p1 = por %p985_p13, %p984_p11 }
  0x35   : > { %p982_p8 = pneg %p981_p6 }
  0x36   : > { %p988_p3 = por %p987_p2, %p986_p1 }
  0x38   : > { %p989_p0 = pnand %p988_p3, %p982_p8 }
  0x3a   : > { %992 = shalt.err (!%p989_p0)
}
  0x3b   : > { %s993_s4 = scalar_lea.vmem %s1239_s22, 4096  ;;  %s1098_s8 = smov [#allocation6]  }
  0x3c   : > { %p994_p10 = scmp.ne.s32.totalorder %s1239_s22, %s993_s4  ;;  %s998_s9 = sshll.u32 %s1098_s8, 4  ;;  %s999_s9 = int_to_ptr.vmem [resolvable:$false] %s998_s9 }
  0x3d   : > { %s1000_s11 = scalar_lea.vmem %s999_s9, 8192  ;;  %p1001_p7 = scmp.lt.s32.totalorder %s1239_s22, %s999_s9 }
  0x3e   : > { %p996_p5 = pnand %p994_p10, %p950_p12  ;;  %p1002_p11 = scmp.lt.s32.totalorder %s1000_s11, %s993_s4 }
  0x40   : > { %p997_p6 = pneg %p996_p5  ;;  %p1003_p13 = por %p1002_p11, %p1001_p7 }
  0x42   : > { %p1004_p1 = pnand %p1003_p13, %p997_p6 }
  0x44   : > { %1007 = shalt.err (!%p1004_p1)
}
  0x45   : > { %s1099_s12 = smov 64   ;;  %s1100_s21 = smov 4  }
  0x46   : > { %849 = dma.hbm_to_vmem [thread:$0]  (!%p1190_p9), %s1237_s20, 4096, %s1239_s22, %s179_s30, %s1099_s12, %s1099_s12, %s1100_s21  }
  0x47   : > { %201 = sbr.rel (%p1230_p4) target bundleno = 384 (0x180), region = 32  ;;  %s203_s5 = sand.u32 (!%p1230_p4), 1, %s1076_s13  }
  0x48   : > { %s744_s7 = sshll.u32 (!%p1230_p4), %s203_s5, 5  ;;  %s204_s26 = scalar_lea.sflag (!%p1230_p4), [#allocation4], %s203_s5 }
  0x49   : > { %s1270_s27 = scalar_lea.vmem (!%p1230_p4), [#allocation3], %s744_s7  ;;  %p1379_p7 = scmp.ne.s32.totalorder (!%p1230_p4), %s1375_s23, 0 }
  0x4e   : > { %1059 = dma.done.wait (%p1379_p7), %s204_s26, 512  }
  0x4f   : > { %1061 = vsyncadd (%p1379_p7), %s204_s26, 4294966784  ;;  %s745_s28 = sshll.u32 %s203_s5, 8  ;;  %s213_s6 = scalar_lea.sflag [#allocation7], %s203_s5 }
  0x50   : > { %s1276_s25 = scalar_lea.vmem [#allocation6], %s745_s28 }
  0x51   : > { %1063 = dma.done.wait (%p1379_p7), %s213_s6, 4096  }
  0x52   : > { %1065 = vsyncadd (%p1379_p7), %s213_s6, 4294963200  ;;  %p746_p9 = scmp.ne.s32.totalorder %s1084_s15, 0 }
  0x53   : > { %v1101_v0 = vmov (!%p746_p9), 0.0  }
  0x54   : > { %247 = sbr.rel (%p746_p9) target bundleno = 91 (0x5b), region = 44  ;;  %248 = vst [vmem:[#allocation2] sm:$0xff] (!%p746_p9), %v1101_v0  ;;  %249 = vst [vmem:[#allocation2 + $0x8] sm:$0xff] (!%p746_p9), %v1101_v0 }
  0x5b PF: > { %v910_v1 = vld [vmem:[%s1276_s25 + $0x40] sm:$0xff]   ;;  %v914_v5 = vld [vmem:[%s1276_s25 + $0x48] sm:$0xff]   ;;  %v918_v9 = vld [vmem:[%s1276_s25 + $0x50] sm:$0xff]   ;;  %p783_p12 = scmp.ne.s32.totalorder %s1084_s15, 1 }
  0x5c   : > { %v911_v2 = vld [vmem:[%s1276_s25 + $0xc0] sm:$0xff]   ;;  %791 = vmatprep.subr.bf16.mxu0 %v910_v1  ;;  %v915_v6 = vld [vmem:[%s1276_s25 + $0xc8] sm:$0xff]   ;;  %v919_v10 = vld [vmem:[%s1276_s25 + $0xd0] sm:$0xff]  }
  0x5d   : > { %v912_v3 = vld [vmem:[%s1276_s25] sm:$0xff]   ;;  %813 = vmatprep.subr.bf16.mxu1 %v911_v2  ;;  %v916_v7 = vld [vmem:[%s1276_s25 + $0x8] sm:$0xff]   ;;  %v920_v11 = vld [vmem:[%s1276_s25 + $0x10] sm:$0xff]  }
  0x5e   : > { %v913_v4 = vld [vmem:[%s1276_s25 + $0x80] sm:$0xff]   ;;  %792 = vmatpush3.bf16.msra.mxu0 %v912_v3  ;;  %v917_v8 = vld [vmem:[%s1276_s25 + $0x88] sm:$0xff]   ;;  %v921_v12 = vld [vmem:[%s1276_s25 + $0x90] sm:$0xff]  }
  0x5f   : > { %814 = vmatpush3.bf16.msra.mxu1 %v913_v4  ;;  %793 = vmatprep.subr.bf16.mxu0 %v914_v5  ;;  %v922_v13 = vld [vmem:[%s1276_s25 + $0x58] sm:$0xff]   ;;  %v926_v17 = vld [vmem:[%s1276_s25 + $0x60] sm:$0xff]   ;;  %v930_v21 = vld [vmem:[%s1276_s25 + $0x68] sm:$0xff]  }
  0x60   : > { %815 = vmatprep.subr.bf16.mxu1 %v915_v6  ;;  %v923_v14 = vld [vmem:[%s1276_s25 + $0xd8] sm:$0xff]   ;;  %v927_v18 = vld [vmem:[%s1276_s25 + $0xe0] sm:$0xff]   ;;  %v931_v22 = vld [vmem:[%s1276_s25 + $0xe8] sm:$0xff]  }
  0x61   : > { %v924_v15 = vld [vmem:[%s1276_s25 + $0x18] sm:$0xff]   ;;  %v928_v19 = vld [vmem:[%s1276_s25 + $0x20] sm:$0xff]   ;;  %v932_v23 = vld [vmem:[%s1276_s25 + $0x28] sm:$0xff]  }
  0x62   : > { %794 = vmatpush3.bf16.msra.mxu0 %v916_v7  ;;  %v925_v16 = vld [vmem:[%s1276_s25 + $0x98] sm:$0xff]   ;;  %v929_v20 = vld [vmem:[%s1276_s25 + $0xa0] sm:$0xff]   ;;  %v933_v24 = vld [vmem:[%s1276_s25 + $0xa8] sm:$0xff]  }
  0x63   : > { %816 = vmatpush3.bf16.msra.mxu1 %v917_v8  ;;  %795 = vmatprep.subr.bf16.mxu0 %v918_v9  ;;  %v934_v25 = vld [vmem:[%s1276_s25 + $0x70] sm:$0xff]   ;;  %v938_v29 = vld [vmem:[%s1276_s25 + $0x78] sm:$0xff]  }
  0x64   : > { %817 = vmatprep.subr.bf16.mxu1 %v919_v10  ;;  %v935_v26 = vld [vmem:[%s1276_s25 + $0xf0] sm:$0xff]   ;;  %v939_v30 = vld [vmem:[%s1276_s25 + $0xf8] sm:$0xff]  }
  0x65   : > { %v936_v27 = vld [vmem:[%s1276_s25 + $0x30] sm:$0xff]   ;;  %v940_v31 = vld [vmem:[%s1276_s25 + $0x38] sm:$0xff]  }
  0x66   : > { %796 = vmatpush3.bf16.msra.mxu0 %v920_v11  ;;  %v937_v28 = vld [vmem:[%s1276_s25 + $0xb0] sm:$0xff]   ;;  %v941_v32 = vld [vmem:[%s1276_s25 + $0xb8] sm:$0xff]  }
  0x67   : > { %818 = vmatpush3.bf16.msra.mxu1 %v921_v12  ;;  %797 = vmatprep.subr.bf16.mxu0 %v922_v13  ;;  %v942_v33 = vld [vmem:[%s1270_s27] ss:$16 sps:$4 sm:$0xff]   ;;  %v944_v34 = vld [vmem:[%s1270_s27 + $0x4] ss:$16 sps:$4 sm:$0xff]   ;;  %v945_v35 = vld [vmem:[%s1270_s27 + $0x8] ss:$16 sps:$4 sm:$0xff]  }
  0x68   : > { %819 = vmatprep.subr.bf16.mxu1 %v923_v14  ;;  %v947_v36 = vld [vmem:[%s1270_s27 + $0xc] ss:$16 sps:$4 sm:$0xff]   ;;  %564 = vmatprep.mubr.bf16.mxu0 %v944_v34  ;;  %v250_v46 = vld [vmem:[#allocation2] sm:$0xff] }
  0x69   : > { %605 = vmatprep.mubr.bf16.mxu1 %v947_v36  ;;  %v251_v51 = vld [vmem:[#allocation2 + $0x8] sm:$0xff]  ;;  %v784_v56 = vld [vmem:[%s1371_s2] ss:$0 sm:$0xff] (!%p783_p12) }
  0x6a   : > { %798 = vmatpush3.bf16.msra.mxu0 %v924_v15 }
  0x6b   : > { %820 = vmatpush3.bf16.msra.mxu1 %v925_v16  ;;  %799 = vmatprep.subr.bf16.mxu0 %v926_v17 }
  0x6c   : > { %821 = vmatprep.subr.bf16.mxu1 %v927_v18 }
  0x6e   : > { %800 = vmatpush3.bf16.msra.mxu0 %v928_v19 }
  0x6f   : > { %822 = vmatpush3.bf16.msra.mxu1 %v929_v20  ;;  %801 = vmatprep.subr.bf16.mxu0 %v930_v21 }
  0x70   : > { %823 = vmatprep.subr.bf16.mxu1 %v931_v22 }
  0x72   : > { %802 = vmatpush3.bf16.msra.mxu0 %v932_v23 }
  0x73   : > { %824 = vmatpush3.bf16.msra.mxu1 %v933_v24  ;;  %803 = vmatprep.subr.bf16.mxu0 %v934_v25 }
  0x74   : > { %825 = vmatprep.subr.bf16.mxu1 %v935_v26 }
  0x76   : > { %804 = vmatpush3.bf16.msra.mxu0 %v936_v27 }
  0x77   : > { %826 = vmatpush3.bf16.msra.mxu1 %v937_v28  ;;  %805 = vmatprep.subr.bf16.mxu0 %v938_v29 }
  0x78   : > { %827 = vmatprep.subr.bf16.mxu1 %v939_v30 }
  0x7a   : > { %806 = vmatpush3.bf16.msra.mxu0 %v940_v31 }
  0x7b   : > { %828 = vmatpush3.bf16.msra.mxu1 %v941_v32 }
  0x7d   : > { %565 = vmatmul.mubr.bf16.vlgmr.msra.gmra.mrb[0].mxu0 %v942_v33 }
  0x7e   : > { %606 = vmatmul.mubr.bf16.vlgmr.msra.gmra.mrb[0].mxu1 %v945_v35 }
 0x150   : > { %v807_v37 = vpop.f32.mrb[0].mxu0 }
 0x151   : > { %v829_v38 = vpop.f32.mrb[0].mxu1  ;;  %v808_v39 = vpop.f32.mrb[1].mxu0 }
 0x152   : > { %v809_v40 = vadd.f32 %v808_v39, %v807_v37  ;;  %v830_v41 = vpop.f32.mrb[1].mxu1  ;;  %v810_v42 = vpop.f32.mrb[2].mxu0 }
 0x153   : > { %v831_v43 = vadd.f32 %v830_v41, %v829_v38  ;;  %v832_v44 = vpop.f32.mrb[2].mxu1  ;;  %v811_v45 = vpop.f32.mrb[3].mxu0 }
 0x154   : > { %v812_v47 = vadd.f32 %v811_v45, %v810_v42  ;;  %v833_v48 = vpop.f32.mrb[3].mxu1 }
 0x155   : > { %v608_v49 = vadd.f32 %v831_v43, %v809_v40  ;;  %v834_v50 = vadd.f32 %v833_v48, %v832_v44  ;;  %621 = sbr.rel (%p783_p12) target bundleno = 358 (0x166), region = 48 }
 0x157   : > { %v614_v52 = vadd.f32 %v608_v49, %v250_v46  ;;  %v611_v53 = vadd.f32 %v834_v50, %v812_v47 }
 0x159   : > { %616 = vst [vmem:[#allocation2] sm:$0xff] %v614_v52  ;;  %v615_v54 = vadd.f32 %v611_v53, %v251_v51 }
 0x15b   : > { %617 = vst [vmem:[#allocation2 + $0x8] sm:$0xff] %v615_v54 }
 0x160   : > { %v622_v55 = vld [vmem:[#allocation2] sm:$0xff] }
 0x161   : > { %v631_v58 = vadd.f32 %v784_v56, %v622_v55 }
 0x162   : > { %v623_v57 = vld [vmem:[#allocation2 + $0x8] sm:$0xff] }
 0x163   : > { %v632_v59 = vadd.f32 %v784_v56, %v623_v57  ;;  %633 = vst [vmem:[#allocation8] sm:$0xff] %v631_v58 }
 0x165   : > { %634 = vst [vmem:[#allocation8 + $0x8] sm:$0xff] %v632_v59 }
 0x166 PF: > { %p1325_p4 = scmp.eq.s32.totalorder %s734_s18, 1  ;;  %s1102_s15 = smov [#allocation8]  }
 0x167   : > { %s644_s22 = sshll.u32 %s1102_s15, 4  ;;  %s645_s22 = int_to_ptr.vmem [resolvable:$true] %s644_s22 }
 0x168   : > { %s1008_s30 = scalar_lea.vmem %s645_s22, 256  ;;  %p1015_p0 = scmp.lt.s32.totalorder %s645_s22, %s645_s22 }
 0x169   : > { %p1009_p8 = scmp.ne.s32.totalorder %s645_s22, %s1008_s30  ;;  %p1016_p10 = scmp.lt.s32.totalorder %s1008_s30, %s1008_s30 }
 0x16b   : > { %p1010_p2 = pnand %p1009_p8, %p1325_p4  ;;  %p1017_p5 = por %p1016_p10, %p1015_p0 }
 0x16d   : > { %p1011_p3 = pneg %p1010_p2 }
 0x16f   : > { %p1018_p6 = pnand %p1017_p5, %p1011_p3 }
 0x171   : > { %1021 = shalt.err (!%p1018_p6)
}
 0x172   : > { %s1022_s18 = scalar_lea.hbm %s1372_s3, 256 }
 0x173   : > { %p1023_p11 = scmp.ne.s32.totalorder %s1372_s3, %s1022_s18  ;;  %p1028_p7 = scmp.lt.u32.totalorder %s1022_s18, %s1372_s3 }
 0x175   : > { %p1024_p13 = pnand %p1023_p11, %p1325_p4 }
 0x177   : > { %p1025_p1 = pneg %p1024_p13 }
 0x179   : > { %p1030_p9 = pnand %p1028_p7, %p1025_p1 }
 0x17b   : > { %1033 = shalt.err (!%p1030_p9)
}
 0x17c   : > { %s1103_s21 = smov 128   ;;  %s1104_s5 = smov 8  }
 0x17d   : > { %840 = dma.vmem_to_hbm [thread:$0]  (%p1325_p4), %s645_s22, 256, %s1372_s3, [#allocation5], %s1103_s21, %s1103_s21, %s1104_s5  }
 0x17e   : > { %1067 = dma.done.wait (%p1325_p4), [#allocation5], 256  }
 0x17f   : > { %1069 = vsyncadd (%p1325_p4), [#allocation5], 4294967040 }
 0x180 PF: > { %s20_s17 = sadd.s32 1, %s1092_s17   ;;  %s1381_s12 = smov %s1076_s13 }
 0x181   : > { %p17_p12 = scmp.ge.s32.totalorder %s20_s17, 4   ;;  %s1382_s13 = smov %s1080_s14 }
 0x182   : > { %s1383_s14 = smov %s1176_s24  ;;  %s1384_s15 = smov %s1088_s16 }
 0x183   : > { %s1385_s16 = smov %s1387_s19  ;;  %19 = sbr.rel (!%p17_p12) target bundleno = 7 (0x7), region = 91 }
 0x18a   :  { %660 = vsyncpa [#allocation4], 1 }
 0x18b   :  { %662 = vsyncpa [#allocation4 + $0x1], 1 }
 0x18c   :  { %663 = vsyncpa [#allocation7], 1 }
 0x18d   :  { %665 = vsyncpa [#allocation7 + $0x1], 1 }
 0x18e   :  { %666 = vsyncpa [#allocation5], 1 }
 0x18f   :  { %668 = vsyncpa [#allocation5 + $0x1], 1 }

</bundles_post_ra>
